<compile_context>
chip_gen: v5e
topology: v5e:2x2
jax: 0.10.0
libtpu: 0.0.40
codegen_flags: <defaults>
</compile_context>

<pallas_src>
import jax
import jax.numpy as jnp
from jax.experimental import pallas as pl
from jax.experimental.pallas import tpu as pltpu

HIDDEN = 64          # logical hidden width of the PyTorch module
HIDDEN_PAD = 128     # zero-padded hidden width (full 128-lane vregs)
LANES = 128


def _round_up(n, m):
    return ((n + m - 1) // m) * m


# --------------------------- kernels ---------------------------------------

def actor_fused_kernel(x_ref, w1_ref, b1_ref, w2_ref, b2_ref, w3_ref, b3_ref,
                       out_ref):
    """Whole-batch MLP with the dim-0 softmax fused into the epilogue."""
    # x = log(x + 1)  (matches torch.log(x + 1))
    x = jnp.log(x_ref[...] + 1.0)

    # in_layer + ReLU (f32 matmul, f32 accumulate; padded hidden cols are 0)
    z1 = jnp.maximum(
        jnp.dot(x, w1_ref[...], preferred_element_type=jnp.float32) + b1_ref[...],
        0.0)

    # mid_layer + ReLU
    z2 = jnp.maximum(
        jnp.dot(z1, w2_ref[...], preferred_element_type=jnp.float32) + b2_ref[...],
        0.0)

    # out_layer (lane-dense: padded to 128 output columns)
    logits = (jnp.dot(z2, w3_ref[...], preferred_element_type=jnp.float32)
              + b3_ref[...])

    # Softmax over dim 0 (batch), fused: sublane (XLU) max/sum + EUP exp.
    m = jnp.max(logits, axis=0, keepdims=True)
    e = jnp.exp(logits - m)
    s = jnp.sum(e, axis=0, keepdims=True)
    out_ref[...] = e / s   # exact divide: normalization stays tight; not on a hot slot


def actor_logits_kernel(x_ref, w1_ref, b1_ref, w2_ref, b2_ref, w3_ref, b3_ref,
                        out_ref):
    """Batch-tiled MLP producing (padded) logits; softmax done in XLA."""
    x = jnp.log(x_ref[...] + 1.0)
    z1 = jnp.maximum(
        jnp.dot(x, w1_ref[...], preferred_element_type=jnp.float32) + b1_ref[...],
        0.0)
    z2 = jnp.maximum(
        jnp.dot(z1, w2_ref[...], preferred_element_type=jnp.float32) + b2_ref[...],
        0.0)
    out_ref[...] = (jnp.dot(z2, w3_ref[...], preferred_element_type=jnp.float32)
                    + b3_ref[...])


# --------------------------- wrapper ----------------------------------------

def _pad_params(params, a_pad):
    """Zero-pad hidden dim to 128 and output dim to a multiple of 128."""
    w1, b1, w2, b2, w3, b3 = params
    A = w3.shape[1]
    dh = HIDDEN_PAD - HIDDEN
    w1p = jnp.pad(w1.astype(jnp.float32), ((0, 0), (0, dh)))
    b1p = jnp.pad(b1.astype(jnp.float32), ((0, 0), (0, dh)))
    w2p = jnp.pad(w2.astype(jnp.float32), ((0, dh), (0, dh)))
    b2p = jnp.pad(b2.astype(jnp.float32), ((0, 0), (0, dh)))
    w3p = jnp.pad(w3.astype(jnp.float32), ((0, dh), (0, a_pad - A)))
    b3p = jnp.pad(b3.astype(jnp.float32), ((0, 0), (0, a_pad - A)))
    return w1p, b1p, w2p, b2p, w3p, b3p


def actor_forward(x, params, *, max_fused_batch=8192, tile_b=2048):
    """Full forward pass matching the PyTorch Actor.forward."""
    B, F = x.shape
    A = params[4].shape[1]
    a_pad = _round_up(max(A, 1), LANES)
    w1p, b1p, w2p, b2p, w3p, b3p = _pad_params(params, a_pad)

    weight_specs = [
        pl.BlockSpec((F, HIDDEN_PAD), lambda i: (0, 0)),           # w1 (resident)
        pl.BlockSpec((1, HIDDEN_PAD), lambda i: (0, 0)),           # b1
        pl.BlockSpec((HIDDEN_PAD, HIDDEN_PAD), lambda i: (0, 0)),  # w2
        pl.BlockSpec((1, HIDDEN_PAD), lambda i: (0, 0)),           # b2
        pl.BlockSpec((HIDDEN_PAD, a_pad), lambda i: (0, 0)),       # w3 (padded)
        pl.BlockSpec((1, a_pad), lambda i: (0, 0)),                # b3 (padded)
    ]

    if B <= max_fused_batch:
        # Single grid step: whole batch resident in VMEM, softmax fused in-kernel.
        # Full-array block shapes -> no wrapper-side padding of x needed.
        probs = pl.pallas_call(
            actor_fused_kernel,
            out_shape=jax.ShapeDtypeStruct((B, a_pad), jnp.float32),
            grid_spec=pltpu.PrefetchScalarGridSpec(
                num_scalar_prefetch=0,
                grid=(1,),
                in_specs=[pl.BlockSpec((B, F), lambda i: (0, 0))] + weight_specs,
                out_specs=pl.BlockSpec((B, a_pad), lambda i: (0, 0)),
            ),
            compiler_params=pltpu.CompilerParams(
                dimension_semantics=("arbitrary",),
                vmem_limit_bytes=32 * 1024 * 1024,   # safe on v7x's 64 MiB VMEM
            ),
        )(x, w1p, b1p, w2p, b2p, w3p, b3p)
        return probs[:, :A]

    # ---- multi-tile fallback for very large B --------------------------------
    # dim-0 softmax couples all batch tiles, so it is hoisted into XLA on the
    # small sliced (B, A) logits; batch tiles are independent -> "parallel"
    # (engages v7x megacore sharding across both TensorCores).
    tb = max(8, min(_round_up(tile_b, 8), _round_up(B, 8)))
    b_pad = _round_up(B, tb)
    if b_pad != B:
        x = jnp.pad(x, ((0, b_pad - B), (0, 0)))
    grid = (b_pad // tb,)

    logits = pl.pallas_call(
        actor_logits_kernel,
        out_shape=jax.ShapeDtypeStruct((b_pad, a_pad), jnp.float32),
        grid_spec=pltpu.PrefetchScalarGridSpec(
            num_scalar_prefetch=0,
            grid=grid,
            in_specs=[pl.BlockSpec((tb, F), lambda i: (i, 0))] + weight_specs,
            out_specs=pl.BlockSpec((tb, a_pad), lambda i: (i, 0)),
        ),
        compiler_params=pltpu.CompilerParams(
            dimension_semantics=("parallel",),
            vmem_limit_bytes=32 * 1024 * 1024,
        ),
    )(x, w1p, b1p, w2p, b2p, w3p, b3p)

    logits = logits[:B, :A]   # padded rows/cols removed before the coupled softmax
    return jax.nn.softmax(logits, axis=0)


# --------------------------- init / reference -------------------------------

def init_params(key, feature_space, action_space):
    """PyTorch-Linear-style init: U(-1/sqrt(fan_in), 1/sqrt(fan_in)); W stored (in, out)."""
    def linear(k, fan_in, fan_out):
        kw, kb = jax.random.split(k)
        bound = 1.0 / float(fan_in) ** 0.5
        w = jax.random.uniform(kw, (fan_in, fan_out), jnp.float32, -bound, bound)
        b = jax.random.uniform(kb, (1, fan_out), jnp.float32, -bound, bound)
        return w, b

    k1, k2, k3 = jax.random.split(key, 3)
    w1, b1 = linear(k1, feature_space, HIDDEN)
    w2, b2 = linear(k2, HIDDEN, HIDDEN)
    w3, b3 = linear(k3, HIDDEN, action_space)
    return w1, b1, w2, b2, w3, b3


def actor_reference(x, params):
    """Pure-JAX f32 reference of the PyTorch forward pass."""
    w1, b1, w2, b2, w3, b3 = params
    x = jnp.log(x + 1.0)
    z1 = jnp.maximum(x @ w1 + b1, 0.0)
    z2 = jnp.maximum(z1 @ w2 + b2, 0.0)
    a3 = z2 @ w3 + b3
    return jax.nn.softmax(a3, axis=0)


# TODO(synk): Adam optimizer state / .to(device) from the PyTorch module are
# training-time concerns, not part of forward; intentionally not translated.

if __name__ == "__main__":
    key = jax.random.PRNGKey(0)
    k_x, k_p = jax.random.split(key)

    batch = 200           # not a multiple of 128 -> exercises full-array (no-pad) blocks
    feature_space = 16
    action_space = 4

    # non-negative inputs so log(x + 1) is well-defined (as in the RL usage)
    x = jax.random.uniform(k_x, (batch, feature_space), jnp.float32, 0.0, 1.0)
    params = init_params(k_p, feature_space, action_space)

    out = actor_forward(x, params)      # single fused grid step, softmax in-kernel
    out = jax.block_until_ready(out)

    ref = actor_reference(x, params)
    assert out.shape == (batch, action_space)
    assert jnp.allclose(jnp.sum(out, axis=0), 1.0, atol=1e-4), "softmax columns must sum to 1"
    assert jnp.allclose(out, ref, atol=2e-3, rtol=3e-2), "mismatch vs f32 JAX reference"

    print("KERNEL_OK")
</pallas_src>

<mosaic_0001>
module attributes {stable_mosaic.version = 11 : i64} {
  func.func @actor_fused_kernel(%arg0: i32, %arg1: memref<200x16xf32, #tpu.memory_space<vmem>>, %arg2: memref<16x128xf32, #tpu.memory_space<vmem>>, %arg3: memref<1x128xf32, #tpu.memory_space<vmem>>, %arg4: memref<128x128xf32, #tpu.memory_space<vmem>>, %arg5: memref<1x128xf32, #tpu.memory_space<vmem>>, %arg6: memref<128x128xf32, #tpu.memory_space<vmem>>, %arg7: memref<1x128xf32, #tpu.memory_space<vmem>>, %arg8: memref<200x128xf32, #tpu.memory_space<vmem>>) attributes {dimension_semantics = [#tpu.dimension_semantics<arbitrary>], iteration_bounds = array<i64: 1>, scalar_prefetch = 0 : i64, scratch_operands = 0 : i64, tpu.core_type = #tpu.core_type<tc>, window_params = [{pipeline_mode = #tpu.pipeline_mode<synchronous>, transform_indices = @transform_0, window_bounds = array<i64: 200, 16>}, {pipeline_mode = #tpu.pipeline_mode<synchronous>, transform_indices = @transform_1, window_bounds = array<i64: 16, 128>}, {pipeline_mode = #tpu.pipeline_mode<synchronous>, transform_indices = @transform_2, window_bounds = array<i64: 1, 128>}, {pipeline_mode = #tpu.pipeline_mode<synchronous>, transform_indices = @transform_3, window_bounds = array<i64: 128, 128>}, {pipeline_mode = #tpu.pipeline_mode<synchronous>, transform_indices = @transform_4, window_bounds = array<i64: 1, 128>}, {pipeline_mode = #tpu.pipeline_mode<synchronous>, transform_indices = @transform_5, window_bounds = array<i64: 128, 128>}, {pipeline_mode = #tpu.pipeline_mode<synchronous>, transform_indices = @transform_6, window_bounds = array<i64: 1, 128>}, {pipeline_mode = #tpu.pipeline_mode<synchronous>, transform_indices = @transform_7, window_bounds = array<i64: 200, 128>}]} {
    %c0 = arith.constant 0 : index
    %c0_0 = arith.constant 0 : index
    %0 = vector.load %arg1[%c0, %c0_0] : memref<200x16xf32, #tpu.memory_space<vmem>>, vector<200x16xf32>
    %cst = arith.constant 1.000000e+00 : f32
    %1 = vector.broadcast %cst : f32 to vector<200x16xf32>
    %2 = arith.addf %0, %1 : vector<200x16xf32>
    %3 = math.log %2 : vector<200x16xf32>
    %c0_1 = arith.constant 0 : index
    %c0_2 = arith.constant 0 : index
    %4 = vector.load %arg2[%c0_1, %c0_2] : memref<16x128xf32, #tpu.memory_space<vmem>>, vector<16x128xf32>
    %cst_3 = arith.constant dense<0.000000e+00> : vector<200x128xf32>
    %5 = tpu.matmul %3, %4, %cst_3 {dimension_numbers = #tpu.dot_dimension_numbers<[1], [0], [0], [1], [0, 0, 1, 1], [], []>} : vector<200x16xf32>, vector<16x128xf32>, vector<200x128xf32> -> vector<200x128xf32>
    %c0_4 = arith.constant 0 : index
    %c0_5 = arith.constant 0 : index
    %6 = vector.load %arg3[%c0_4, %c0_5] : memref<1x128xf32, #tpu.memory_space<vmem>>, vector<1x128xf32>
    %7 = vector.broadcast %6 : vector<1x128xf32> to vector<200x128xf32>
    %8 = arith.addf %5, %7 : vector<200x128xf32>
    %cst_6 = arith.constant 0.000000e+00 : f32
    %9 = vector.broadcast %cst_6 : f32 to vector<200x128xf32>
    %10 = arith.maximumf %8, %9 : vector<200x128xf32>
    %c0_7 = arith.constant 0 : index
    %c0_8 = arith.constant 0 : index
    %11 = vector.load %arg4[%c0_7, %c0_8] : memref<128x128xf32, #tpu.memory_space<vmem>>, vector<128x128xf32>
    %cst_9 = arith.constant dense<0.000000e+00> : vector<200x128xf32>
    %12 = tpu.matmul %10, %11, %cst_9 {dimension_numbers = #tpu.dot_dimension_numbers<[1], [0], [0], [1], [0, 0, 1, 1], [], []>} : vector<200x128xf32>, vector<128x128xf32>, vector<200x128xf32> -> vector<200x128xf32>
    %c0_10 = arith.constant 0 : index
    %c0_11 = arith.constant 0 : index
    %13 = vector.load %arg5[%c0_10, %c0_11] : memref<1x128xf32, #tpu.memory_space<vmem>>, vector<1x128xf32>
    %14 = vector.broadcast %13 : vector<1x128xf32> to vector<200x128xf32>
    %15 = arith.addf %12, %14 : vector<200x128xf32>
    %cst_12 = arith.constant 0.000000e+00 : f32
    %16 = vector.broadcast %cst_12 : f32 to vector<200x128xf32>
    %17 = arith.maximumf %15, %16 : vector<200x128xf32>
    %c0_13 = arith.constant 0 : index
    %c0_14 = arith.constant 0 : index
    %18 = vector.load %arg6[%c0_13, %c0_14] : memref<128x128xf32, #tpu.memory_space<vmem>>, vector<128x128xf32>
    %cst_15 = arith.constant dense<0.000000e+00> : vector<200x128xf32>
    %19 = tpu.matmul %17, %18, %cst_15 {dimension_numbers = #tpu.dot_dimension_numbers<[1], [0], [0], [1], [0, 0, 1, 1], [], []>} : vector<200x128xf32>, vector<128x128xf32>, vector<200x128xf32> -> vector<200x128xf32>
    %c0_16 = arith.constant 0 : index
    %c0_17 = arith.constant 0 : index
    %20 = vector.load %arg7[%c0_16, %c0_17] : memref<1x128xf32, #tpu.memory_space<vmem>>, vector<1x128xf32>
    %21 = vector.broadcast %20 : vector<1x128xf32> to vector<200x128xf32>
    %22 = arith.addf %19, %21 : vector<200x128xf32>
    %cst_18 = arith.constant dense<0xFF800000> : vector<128xf32>
    %23 = vector.multi_reduction <maximumf>, %22, %cst_18 [0] : vector<200x128xf32> to vector<128xf32>
    %24 = vector.shape_cast %23 : vector<128xf32> to vector<1x128xf32>
    %25 = vector.broadcast %24 : vector<1x128xf32> to vector<200x128xf32>
    %26 = arith.subf %22, %25 : vector<200x128xf32>
    %27 = math.exp %26 : vector<200x128xf32>
    %cst_19 = arith.constant dense<0.000000e+00> : vector<128xf32>
    %28 = vector.multi_reduction <add>, %27, %cst_19 [0] : vector<200x128xf32> to vector<128xf32>
    %29 = vector.shape_cast %28 : vector<128xf32> to vector<1x128xf32>
    %30 = vector.broadcast %29 : vector<1x128xf32> to vector<200x128xf32>
    %31 = arith.divf %27, %30 : vector<200x128xf32>
    %c0_20 = arith.constant 0 : index
    %c0_21 = arith.constant 0 : index
    %32 = vector.load %arg8[%c0_20, %c0_21] : memref<200x128xf32, #tpu.memory_space<vmem>>, vector<200x128xf32>
    tpu.vector_store %arg8[%c0_20, %c0_21], %31 {strides = array<i32>} : memref<200x128xf32, #tpu.memory_space<vmem>>, vector<200x128xf32>,
    return
  }
  func.func @transform_0(%arg0: i32) -> (i32, i32) {
    %c0_i32 = arith.constant 0 : i32
    %c0_i32_0 = arith.constant 0 : i32
    %c0_i32_1 = arith.constant 0 : i32
    return %c0_i32, %c0_i32_0 : i32, i32
  }
  func.func @transform_1(%arg0: i32) -> (i32, i32) {
    %c0_i32 = arith.constant 0 : i32
    %c0_i32_0 = arith.constant 0 : i32
    %c0_i32_1 = arith.constant 0 : i32
    return %c0_i32, %c0_i32_0 : i32, i32
  }
  func.func @transform_2(%arg0: i32) -> (i32, i32) {
    %c0_i32 = arith.constant 0 : i32
    %c0_i32_0 = arith.constant 0 : i32
    %c0_i32_1 = arith.constant 0 : i32
    return %c0_i32, %c0_i32_0 : i32, i32
  }
  func.func @transform_3(%arg0: i32) -> (i32, i32) {
    %c0_i32 = arith.constant 0 : i32
    %c0_i32_0 = arith.constant 0 : i32
    %c0_i32_1 = arith.constant 0 : i32
    return %c0_i32, %c0_i32_0 : i32, i32
  }
  func.func @transform_4(%arg0: i32) -> (i32, i32) {
    %c0_i32 = arith.constant 0 : i32
    %c0_i32_0 = arith.constant 0 : i32
    %c0_i32_1 = arith.constant 0 : i32
    return %c0_i32, %c0_i32_0 : i32, i32
  }
  func.func @transform_5(%arg0: i32) -> (i32, i32) {
    %c0_i32 = arith.constant 0 : i32
    %c0_i32_0 = arith.constant 0 : i32
    %c0_i32_1 = arith.constant 0 : i32
    return %c0_i32, %c0_i32_0 : i32, i32
  }
  func.func @transform_6(%arg0: i32) -> (i32, i32) {
    %c0_i32 = arith.constant 0 : i32
    %c0_i32_0 = arith.constant 0 : i32
    %c0_i32_1 = arith.constant 0 : i32
    return %c0_i32, %c0_i32_0 : i32, i32
  }
  func.func @transform_7(%arg0: i32) -> (i32, i32) {
    %c0_i32 = arith.constant 0 : i32
    %c0_i32_0 = arith.constant 0 : i32
    %c0_i32_1 = arith.constant 0 : i32
    return %c0_i32, %c0_i32_0 : i32, i32
  }
}

</mosaic_0001>

<bundles_post_ra>
// kernel: tpu_custom_call.1
= control target key start
LH: loop header
LB: loop body
LE: loop exit
PB: predicated region body
PF: predicated region fallthrough
CT: control target
= control target key end

     0   :  { %12 = vsyncpa [#allocation3], 0  ;;  %s1531_s0 = inlined_call_operand.vmem [shape: f32[200,16], index: 0, kind: input, shape index: {}]   ;;  %s1532_s1 = inlined_call_operand.vmem [shape: f32[16,128], index: 1, kind: input, shape index: {}]   ;;  %s1533_s2 = inlined_call_operand.vmem [shape: f32[1,128], index: 2, kind: input, shape index: {}]   ;;  %s1534_s3 = inlined_call_operand.vmem [shape: f32[128,128], index: 3, kind: input, shape index: {}]   ;;  %s1535_s4 = inlined_call_operand.vmem [shape: f32[1,128], index: 4, kind: input, shape index: {}]   ;;  %s1536_s5 = inlined_call_operand.hbm [shape: f32[128,128], index: 5, kind: input, shape index: {}]   ;;  %s1537_s6 = inlined_call_operand.vmem [shape: f32[1,128], index: 6, kind: input, shape index: {}]   ;;  %s1538_s7 = inlined_call_operand.hbm [shape: f32[200,128], index: 7, kind: output, shape index: {}]  }
   0x1   :  { %13 = vsyncpa [#allocation4], 0  ;;  %s28_s26 = sshll.u32 %s1536_s5, 4  ;;  %s1029_s27 = smov [#allocation2]   ;;  %s29_s26 = int_to_ptr.hbm [resolvable:$true] %s28_s26 }
   0x2   :  { %s30_s28 = sshll.u32 %s1029_s27, 4  ;;  %s1030_s29 = smov 128   ;;  %s31_s28 = int_to_ptr.vmem [resolvable:$true] %s30_s28 }
   0x3   :  { %s1031_s30 = smov 8  }
   0x4   :  { %36 = dma.hbm_to_vmem [thread:$0]  %s29_s26, 2048, %s31_s28, [#allocation3], %s1030_s29, %s1030_s29, %s1031_s30  }
   0x5   :  { %1025 = dma.done.wait [#allocation3], 2048  }
   0x6   :  { %1026 = vsyncadd [#allocation3], 4294965248  ;;  %v144_v0 = vld [vmem:[%s1532_s1 + $0x8] sm:$0xff]  ;;  %v143_v1 = vld [vmem:[%s1532_s1] sm:$0xff]  ;;  %vm149_vm0 = vcmask 130048   ;;  %s796_s28 = sshll.u32 %s1538_s7, 4  ;;  %s797_s28 = int_to_ptr.hbm [resolvable:$true] %s796_s28 }
   0x7   :  { %v43_v2 = vld [vmem:[%s1531_s0] sm:$0xff]  ;;  %239 = vmatpush.msra.mxu0 %v144_v0  ;;  %v44_v4 = vld [vmem:[%s1531_s0 + $0x8] sm:$0xff]  ;;  %834 = vmatpush.msra.mxu3 %v144_v0  ;;  %v45_v6 = vld [vmem:[%s1531_s0 + $0x10] sm:$0xff] }
   0x8   :  { %v68_v3 = vadd.f32 1.0, %v43_v2  ;;  %v69_v5 = vadd.f32 1.0, %v44_v4  ;;  %v70_v9 = vadd.f32 1.0, %v45_v6  ;;  %v46_v12 = vld [vmem:[%s1531_s0 + $0x18] sm:$0xff]  ;;  %v47_v16 = vld [vmem:[%s1531_s0 + $0x20] sm:$0xff]  ;;  %v48_v20 = vld [vmem:[%s1531_s0 + $0x28] sm:$0xff] }
   0x9   :  { %240 = vmatpush.msra.mxu0 %v143_v1  ;;  %835 = vmatpush.msra.mxu3 %v143_v1  ;;  %v71_v13 = vadd.f32 1.0, %v46_v12  ;;  %v72_v17 = vadd.f32 1.0, %v47_v16  ;;  %v73_v21 = vadd.f32 1.0, %v48_v20  ;;  %v49_v24 = vld [vmem:[%s1531_s0 + $0x30] sm:$0xff]  ;;  %v50_v28 = vld [vmem:[%s1531_s0 + $0x38] sm:$0xff]  ;;  %v51_v32 = vld [vmem:[%s1531_s0 + $0x40] sm:$0xff] }
   0xa   :  { %875 = vlog2.f32 %v68_v3  ;;  %v74_v25 = vadd.f32 1.0, %v49_v24  ;;  %v75_v29 = vadd.f32 1.0, %v50_v28  ;;  %v76_v33 = vadd.f32 1.0, %v51_v32  ;;  %v52_v36 = vld [vmem:[%s1531_s0 + $0x48] sm:$0xff]  ;;  %v53_v40 = vld [vmem:[%s1531_s0 + $0x50] sm:$0xff]  ;;  %v357_v42 = vld [vmem:[%s1534_s3 + $0x78] sm:$0xff] }
   0xb   :  { %877 = vlog2.f32 %v69_v5  ;;  %v77_v37 = vadd.f32 1.0, %v52_v36  ;;  %v78_v41 = vadd.f32 1.0, %v53_v40  ;;  %v356_v43 = vld [vmem:[%s1534_s3 + $0x70] sm:$0xff]  ;;  %362 = vmatpush.msra.mxu1 %v357_v42  ;;  %836 = vmatpush.msrb.mxu3 %v357_v42  ;;  %v355_v45 = vld [vmem:[%s1534_s3 + $0x68] sm:$0xff]  ;;  %v54_v47 = vld [vmem:[%s1531_s0 + $0x58] sm:$0xff] }
   0xc   :  { %879 = vlog2.f32 %v70_v9  ;;  %v79_v48 = vadd.f32 1.0, %v54_v47  ;;  %v354_v49 = vld [vmem:[%s1534_s3 + $0x60] sm:$0xff]  ;;  %v353_v50 = vld [vmem:[%s1534_s3 + $0x58] sm:$0xff]  ;;  %v352_v52 = vld [vmem:[%s1534_s3 + $0x50] sm:$0xff] }
   0xd   :  { %881 = vlog2.f32 %v71_v13  ;;  %363 = vmatpush.msra.mxu1 %v356_v43  ;;  %837 = vmatpush.msrb.mxu3 %v356_v43  ;;  %v55_v54 = vld [vmem:[%s1531_s0 + $0x60] sm:$0xff]  ;;  %v351_v55 = vld [vmem:[%s1534_s3 + $0x48] sm:$0xff]  ;;  %v349_v58 = vld [vmem:[%s1534_s3 + $0x38] sm:$0xff] }
   0xe   :  { %883 = vlog2.f32 %v72_v17  ;;  %v80_v56 = vadd.f32 1.0, %v55_v54  ;;  %v350_v57 = vld [vmem:[%s1534_s3 + $0x40] sm:$0xff]  ;;  %v348_v60 = vld [vmem:[%s1534_s3 + $0x30] sm:$0xff]  ;;  %v56_v62 = vld [vmem:[%s1531_s0 + $0x68] sm:$0xff] }
   0xf   :  { %885 = vlog2.f32 %v73_v21  ;;  %364 = vmatpush.msra.mxu1 %v355_v45  ;;  %838 = vmatpush.msrb.mxu3 %v355_v45  ;;  %v347_v63 = vld [vmem:[%s1534_s3 + $0x28] sm:$0xff]  ;;  %v81_v0 = vadd.f32 1.0, %v56_v62  ;;  %v346_v1 = vld [vmem:[%s1534_s3 + $0x20] sm:$0xff]  ;;  %v345_v2 = vld [vmem:[%s1534_s3 + $0x18] sm:$0xff] }
  0x10   :  { %v876_v7 = vpop.eup %875  ;;  %887 = vlog2.f32 %v74_v25  ;;  %v57_v5 = vld [vmem:[%s1531_s0 + $0x70] sm:$0xff]  ;;  %v342_v9 = vld [vmem:[%s1534_s3] sm:$0xff]  ;;  %v58_v12 = vld [vmem:[%s1531_s0 + $0x78] sm:$0xff] }
  0x11   :  { %v94_v8 = vmul.f32 0.6931472, %v876_v7  ;;  %v878_v10 = vpop.eup %877  ;;  %889 = vlog2.f32 %v75_v29  ;;  %365 = vmatpush.msra.mxu1 %v354_v49  ;;  %839 = vmatpush.msrb.mxu3 %v354_v49  ;;  %v344_v6 = vld [vmem:[%s1534_s3 + $0x10] sm:$0xff]  ;;  %v343_v7 = vld [vmem:[%s1534_s3 + $0x8] sm:$0xff]  ;;  %v83_v13 = vadd.f32 1.0, %v58_v12  ;;  %v59_v16 = vld [vmem:[%s1531_s0 + $0x80] sm:$0xff] }
  0x12   :  { %v96_v11 = vmul.f32 0.6931472, %v878_v10  ;;  %v880_v14 = vpop.eup %879  ;;  %891 = vlog2.f32 %v76_v33  ;;  %v84_v17 = vadd.f32 1.0, %v59_v16  ;;  %v60_v20 = vld [vmem:[%s1531_s0 + $0x88] sm:$0xff]  ;;  %v1209_v25 = vld [vmem:[%s1533_s2] ss:$0 sm:$0xff] }
  0x13   :  { %809 = vmatmul.msk.f32.vlgmr.msra.gmra.mxu0 %vm149_vm0, %v94_v8  ;;  %v98_v15 = vmul.f32 0.6931472, %v880_v14  ;;  %v882_v18 = vpop.eup %881  ;;  %893 = vlog2.f32 %v77_v37  ;;  %366 = vmatpush.msra.mxu1 %v353_v50  ;;  %v82_v8 = vadd.f32 1.0, %v57_v5  ;;  %v64_v21 = vld [vmem:[%s1531_s0 + $0xa8] sm:$0xff]  ;;  %v63_v49 = vld [vmem:[%s1531_s0 + $0xa0] sm:$0xff] }
  0x14   :  { %v100_v19 = vmul.f32 0.6931472, %v882_v18  ;;  %v884_v22 = vpop.eup %883  ;;  %895 = vlog2.f32 %v78_v41  ;;  %840 = vmatpush.msrb.mxu3 %v353_v50  ;;  %v66_v41 = vld [vmem:[%s1531_s0 + $0xb8] sm:$0xff]  ;;  %v88_v54 = vadd.f32 1.0, %v63_v49 }
  0x15   :  { %v102_v23 = vmul.f32 0.6931472, %v884_v22  ;;  %v886_v26 = vpop.eup %885  ;;  %897 = vlog2.f32 %v79_v48  ;;  %367 = vmatpush.msra.mxu1 %v352_v52  ;;  %v85_v22 = vadd.f32 1.0, %v60_v20 }
  0x16   :  { %v104_v27 = vmul.f32 0.6931472, %v886_v26  ;;  %v888_v30 = vpop.eup %887  ;;  %841 = vmatpush.msrb.mxu3 %v352_v52  ;;  %899 = vlog2.f32 %v80_v56  ;;  %v67_v52 = vld [vmem:[%s1531_s0 + $0xc0] sm:$0xff] }
  0x17   :  { %v106_v31 = vmul.f32 0.6931472, %v888_v30  ;;  %v890_v34 = vpop.eup %889  ;;  %368 = vmatpush.msra.mxu1 %v351_v55  ;;  %901 = vlog2.f32 %v81_v0  ;;  %v65_v30 = vld [vmem:[%s1531_s0 + $0xb0] sm:$0xff] }
  0x18   :  { %v108_v35 = vmul.f32 0.6931472, %v890_v34  ;;  %v892_v38 = vpop.eup %891  ;;  %842 = vmatpush.msrb.mxu3 %v351_v55  ;;  %903 = vlog2.f32 %v82_v8  ;;  %v90_v33 = vadd.f32 1.0, %v65_v30  ;;  %v92_v55 = vadd.f32 1.0, %v67_v52 }
  0x19   :  { %v110_v39 = vmul.f32 0.6931472, %v892_v38  ;;  %v894_v44 = vpop.eup %893  ;;  %369 = vmatpush.msra.mxu1 %v350_v57  ;;  %905 = vlog2.f32 %v83_v13  ;;  %v62_v38 = vld [vmem:[%s1531_s0 + $0x98] sm:$0xff] }
  0x1a   :  { %v112_v46 = vmul.f32 0.6931472, %v894_v44  ;;  %v896_v51 = vpop.eup %895  ;;  %843 = vmatpush.msrb.mxu3 %v350_v57  ;;  %907 = vlog2.f32 %v84_v17  ;;  %v87_v43 = vadd.f32 1.0, %v62_v38  ;;  %v91_v44 = vadd.f32 1.0, %v66_v41  ;;  %v484_v38 = vld [vmem:[#allocation2 + $0x28] sm:$0xff] }
  0x1b   :  { %810 = vmatmul.msk.f32.gmra.mxu0 %vm149_vm0, %v96_v11  ;;  %v114_v53 = vmul.f32 0.6931472, %v896_v51  ;;  %v898_v59 = vpop.eup %897  ;;  %370 = vmatpush.msra.mxu1 %v349_v58 }
  0x1c   :  { %844 = vmatpush.msrb.mxu3 %v349_v58  ;;  %v116_v61 = vmul.f32 0.6931472, %v898_v59  ;;  %v900_v3 = vpop.eup %899 }
  0x1d   :  { %371 = vmatpush.msra.mxu1 %v348_v60  ;;  %v118_v4 = vmul.f32 0.6931472, %v900_v3  ;;  %v902_v10 = vpop.eup %901 }
  0x1e   :  { %845 = vmatpush.msrb.mxu3 %v348_v60  ;;  %v120_v11 = vmul.f32 0.6931472, %v902_v10  ;;  %v904_v14 = vpop.eup %903 }
  0x1f   :  { %372 = vmatpush.msra.mxu1 %v347_v63  ;;  %v906_v18 = vpop.eup %905 }
  0x20   :  { %846 = vmatpush.msrb.mxu3 %v347_v63  ;;  %v908_v24 = vpop.eup %907 }
  0x21   :  { %373 = vmatpush.msra.mxu1 %v346_v1  ;;  %v126_v26 = vmul.f32 0.6931472, %v908_v24  ;;  %v491_v24 = vld [vmem:[#allocation2 + $0x60] sm:$0xff] }
  0x22   :  { %847 = vmatpush.msrb.mxu3 %v346_v1 }
  0x23   :  { %811 = vmatmul.msk.f32.gmra.mxu0 %vm149_vm0, %v98_v15  ;;  %374 = vmatpush.msra.mxu1 %v345_v2  ;;  %v122_v15 = vmul.f32 0.6931472, %v904_v14 }
  0x24   :  { %848 = vmatpush.msrb.mxu3 %v345_v2 }
  0x25   :  { %375 = vmatpush.msra.mxu1 %v344_v6 }
  0x26   :  { %849 = vmatpush.msrb.mxu3 %v344_v6 }
  0x27   :  { %376 = vmatpush.msra.mxu1 %v343_v7 }
  0x28   :  { %850 = vmatpush.msrb.mxu3 %v343_v7 }
  0x29   :  { %377 = vmatpush.msra.mxu1 %v342_v9 }
  0x2a   :  { %851 = vmatpush.msrb.mxu3 %v342_v9 }
  0x2b   :  { %812 = vmatmul.msk.f32.gmra.mxu0 %vm149_vm0, %v100_v19  ;;  %v124_v19 = vmul.f32 0.6931472, %v906_v18  ;;  %v494_v18 = vld [vmem:[#allocation2 + $0x78] sm:$0xff] }
  0x2c   :  { %499 = vmatpush.msra.mxu2 %v494_v18 }
  0x33   :  { %813 = vmatmul.msk.f32.gmra.mxu0 %vm149_vm0, %v102_v23  ;;  %v89_v23 = vadd.f32 1.0, %v64_v21  ;;  %v493_v21 = vld [vmem:[#allocation2 + $0x70] sm:$0xff] }
  0x34   :  { %500 = vmatpush.msra.mxu2 %v493_v21 }
  0x35   :  { %909 = vlog2.f32 %v89_v23  ;;  %v492_v23 = vld [vmem:[#allocation2 + $0x68] sm:$0xff] }
  0x36   :  { %911 = vlog2.f32 %v85_v22  ;;  %501 = vmatpush.msra.mxu2 %v492_v23 }
  0x37   :  { %913 = vlog2.f32 %v90_v33  ;;  %v486_v33 = vld [vmem:[#allocation2 + $0x38] sm:$0xff] }
  0x38   :  { %502 = vmatpush.msra.mxu2 %v491_v24 }
  0x3b   :  { %814 = vmatmul.msk.f32.gmra.mxu0 %vm149_vm0, %v104_v27  ;;  %v61_v27 = vld [vmem:[%s1531_s0 + $0x90] sm:$0xff] }
  0x3c   :  { %v86_v32 = vadd.f32 1.0, %v61_v27 }
  0x3e   :  { %915 = vlog2.f32 %v86_v32  ;;  %v487_v32 = vld [vmem:[#allocation2 + $0x40] sm:$0xff] }
  0x3f   :  { %917 = vlog2.f32 %v91_v44 }
  0x40   :  { %919 = vlog2.f32 %v87_v43  ;;  %v481_v43 = vld [vmem:[#allocation2 + $0x10] sm:$0xff] }
  0x41   :  { %921 = vlog2.f32 %v92_v55 }
  0x42   :  { %923 = vlog2.f32 %v88_v54 }
  0x43   :  { %815 = vmatmul.msk.f32.gmra.mxu0 %vm149_vm0, %v106_v31  ;;  %v910_v31 = vpop.eup %909 }
  0x44   :  { %v912_v36 = vpop.eup %911 }
  0x45   :  { %v128_v37 = vmul.f32 0.6931472, %v912_v36  ;;  %v914_v42 = vpop.eup %913  ;;  %v485_v36 = vld [vmem:[#allocation2 + $0x30] sm:$0xff] }
  0x46   :  { %v916_v47 = vpop.eup %915 }
  0x47   :  { %v130_v48 = vmul.f32 0.6931472, %v916_v47 }
  0x4b   :  { %816 = vmatmul.msk.f32.gmra.mxu0 %vm149_vm0, %v108_v35  ;;  %v136_v35 = vmul.f32 0.6931472, %v910_v31  ;;  %v488_v31 = vld [vmem:[#allocation2 + $0x48] sm:$0xff] }
  0x4d   :  { %830 = vmatmul.msk.f32.vlgmr.msra.gmra.mxu3 %vm149_vm0, %v136_v35 }
  0x4e   :  { %852 = vmatpush.msra.mxu3 %v494_v18 }
  0x50   :  { %853 = vmatpush.msra.mxu3 %v493_v21 }
  0x52   :  { %854 = vmatpush.msra.mxu3 %v492_v23 }
  0x53   :  { %817 = vmatmul.msk.f32.gmra.mxu0 %vm149_vm0, %v110_v39 }
  0x54   :  { %855 = vmatpush.msra.mxu3 %v491_v24 }
  0x5b   :  { %818 = vmatmul.msk.f32.gmra.mxu0 %vm149_vm0, %v112_v46  ;;  %v138_v46 = vmul.f32 0.6931472, %v914_v42 }
  0x5d   :  { %831 = vmatmul.msk.f32.gmra.mxu3 %vm149_vm0, %v138_v46  ;;  %v479_v46 = vld [vmem:[#allocation2] sm:$0xff] }
  0x63   :  { %819 = vmatmul.msk.f32.gmra.mxu0 %vm149_vm0, %v114_v53  ;;  %v918_v53 = vpop.eup %917 }
  0x64   :  { %v140_v57 = vmul.f32 0.6931472, %v918_v53  ;;  %v920_v58 = vpop.eup %919 }
  0x65   :  { %v132_v59 = vmul.f32 0.6931472, %v920_v58  ;;  %v922_v62 = vpop.eup %921 }
  0x66   :  { %832 = vmatmul.msk.f32.gmra.mxu3 %vm149_vm0, %v140_v57  ;;  %v142_v0 = vmul.f32 0.6931472, %v922_v62  ;;  %v924_v1 = vpop.eup %923 }
  0x67   :  { %v134_v2 = vmul.f32 0.6931472, %v924_v1 }
  0x6b   :  { %820 = vmatmul.msk.f32.gmra.mxu0 %vm149_vm0, %v116_v61 }
  0x6e   :  { %833 = vmatmul.msk.f32.gmra.mxu3 %vm149_vm0, %v142_v0 }
  0x73   :  { %821 = vmatmul.msk.f32.gmra.mxu0 %vm149_vm0, %v118_v4 }
  0x7b   :  { %822 = vmatmul.msk.f32.gmra.mxu0 %vm149_vm0, %v120_v11 }
  0x83   :  { %823 = vmatmul.msk.f32.gmra.mxu0 %vm149_vm0, %v122_v15 }
  0x8b   :  { %824 = vmatmul.msk.f32.gmra.mxu0 %vm149_vm0, %v124_v19 }
  0x90   :  { %v242_v28 = vpop.f32.mrf.mxu0 }
  0x91   :  { %v243_v29 = vadd.f32 %v1209_v25, %v242_v28 }
  0x93   :  { %v317_v34 = vmax.f32 %v243_v29, 0.0  ;;  %825 = vmatmul.msk.f32.gmra.mxu0 %vm149_vm0, %v126_v26  ;;  %v490_v26 = vld [vmem:[#allocation2 + $0x58] sm:$0xff]  ;;  %v489_v29 = vld [vmem:[#allocation2 + $0x50] sm:$0xff] }
  0x94   :  { %503 = vmatpush.msra.mxu2 %v490_v26  ;;  %856 = vmatpush.msra.mxu3 %v490_v26 }
  0x95   :  { %378 = vmatmul.f32.vlgmr.msra.gmra.mxu1 %v317_v34 }
  0x96   :  { %504 = vmatpush.msra.mxu2 %v489_v29  ;;  %857 = vmatpush.msra.mxu3 %v489_v29 }
  0x98   :  { %v245_v39 = vpop.f32.mrf.mxu0  ;;  %505 = vmatpush.msra.mxu2 %v488_v31  ;;  %858 = vmatpush.msra.mxu3 %v488_v31 }
  0x99   :  { %v246_v40 = vadd.f32 %v1209_v25, %v245_v39  ;;  %v483_v39 = vld [vmem:[#allocation2 + $0x20] sm:$0xff] }
  0x9a   :  { %506 = vmatpush.msra.mxu2 %v487_v32  ;;  %859 = vmatpush.msra.mxu3 %v487_v32 }
  0x9b   :  { %v318_v45 = vmax.f32 %v246_v40, 0.0  ;;  %826 = vmatmul.msk.f32.gmra.mxu0 %vm149_vm0, %v128_v37  ;;  %v482_v40 = vld [vmem:[#allocation2 + $0x18] sm:$0xff] }
  0x9c   :  { %507 = vmatpush.msra.mxu2 %v486_v33  ;;  %860 = vmatpush.msra.mxu3 %v486_v33 }
  0x9d   :  { %381 = vmatmul.f32.gmra.mxu1 %v318_v45  ;;  %v480_v45 = vld [vmem:[#allocation2 + $0x8] sm:$0xff] }
  0x9e   :  { %508 = vmatpush.msra.mxu2 %v485_v36  ;;  %861 = vmatpush.msra.mxu3 %v485_v36 }
  0xa0   :  { %v248_v50 = vpop.f32.mrf.mxu0  ;;  %509 = vmatpush.msra.mxu2 %v484_v38  ;;  %862 = vmatpush.msra.mxu3 %v484_v38 }
  0xa1   :  { %v249_v51 = vadd.f32 %v1209_v25, %v248_v50 }
  0xa2   :  { %510 = vmatpush.msra.mxu2 %v483_v39  ;;  %863 = vmatpush.msra.mxu3 %v483_v39 }
  0xa3   :  { %v319_v56 = vmax.f32 %v249_v51, 0.0  ;;  %827 = vmatmul.msk.f32.gmra.mxu0 %vm149_vm0, %v130_v48 }
  0xa4   :  { %511 = vmatpush.msra.mxu2 %v482_v40  ;;  %864 = vmatpush.msra.mxu3 %v482_v40 }
  0xa5   :  { %384 = vmatmul.f32.gmra.mxu1 %v319_v56  ;;  %v1257_v56 = vld [vmem:[%s1535_s4] ss:$0 sm:$0xff] }
  0xa6   :  { %512 = vmatpush.msra.mxu2 %v481_v43  ;;  %865 = vmatpush.msra.mxu3 %v481_v43 }
  0xa8   :  { %v251_v60 = vpop.f32.mrf.mxu0  ;;  %513 = vmatpush.msra.mxu2 %v480_v45  ;;  %866 = vmatpush.msra.mxu3 %v480_v45 }
  0xa9   :  { %v252_v61 = vadd.f32 %v1209_v25, %v251_v60 }
  0xaa   :  { %514 = vmatpush.msra.mxu2 %v479_v46  ;;  %867 = vmatpush.msra.mxu3 %v479_v46 }
  0xab   :  { %v320_v63 = vmax.f32 %v252_v61, 0.0  ;;  %828 = vmatmul.msk.f32.gmra.mxu0 %vm149_vm0, %v132_v59 }
  0xad   :  { %387 = vmatmul.f32.gmra.mxu1 %v320_v63 }
  0xb0   :  { %v254_v3 = vpop.f32.mrf.mxu0 }
  0xb1   :  { %v255_v4 = vadd.f32 %v1209_v25, %v254_v3 }
  0xb3   :  { %v321_v5 = vmax.f32 %v255_v4, 0.0  ;;  %829 = vmatmul.msk.f32.gmra.mxu0 %vm149_vm0, %v134_v2 }
  0xb5   :  { %390 = vmatmul.f32.gmra.mxu1 %v321_v5 }
  0xb8   :  { %v257_v6 = vpop.f32.mrf.mxu0 }
  0xb9   :  { %v258_v7 = vadd.f32 %v1209_v25, %v257_v6 }
  0xbb   :  { %v322_v8 = vmax.f32 %v258_v7, 0.0 }
  0xbd   :  { %393 = vmatmul.f32.gmra.mxu1 %v322_v8 }
  0xc0   :  { %v260_v9 = vpop.f32.mrf.mxu0 }
  0xc1   :  { %v261_v10 = vadd.f32 %v1209_v25, %v260_v9 }
  0xc3   :  { %v323_v11 = vmax.f32 %v261_v10, 0.0 }
  0xc5   :  { %396 = vmatmul.f32.gmra.mxu1 %v323_v11 }
  0xc8   :  { %v263_v12 = vpop.f32.mrf.mxu0 }
  0xc9   :  { %v264_v13 = vadd.f32 %v1209_v25, %v263_v12 }
  0xcb   :  { %v324_v14 = vmax.f32 %v264_v13, 0.0 }
  0xcd   :  { %399 = vmatmul.f32.gmra.mxu1 %v324_v14 }
  0xd0   :  { %v266_v15 = vpop.f32.mrf.mxu0 }
  0xd1   :  { %v267_v16 = vadd.f32 %v1209_v25, %v266_v15 }
  0xd3   :  { %v325_v17 = vmax.f32 %v267_v16, 0.0  ;;  %v305_v16 = vpop.f32.mrf.mxu3 }
  0xd4   :  { %v306_v24 = vadd.f32 %v1209_v25, %v305_v16 }
  0xd5   :  { %402 = vmatmul.f32.gmra.mxu1 %v325_v17 }
  0xd8   :  { %v269_v19 = vpop.f32.mrf.mxu0 }
  0xd9   :  { %v270_v20 = vadd.f32 %v1209_v25, %v269_v19 }
  0xdb   :  { %v326_v22 = vmax.f32 %v270_v20, 0.0 }
  0xdd   :  { %405 = vmatmul.f32.gmra.mxu1 %v326_v22 }
  0xe0   :  { %v272_v27 = vpop.f32.mrf.mxu0  ;;  %v308_v26 = vpop.f32.mrf.mxu3 }
  0xe1   :  { %v273_v28 = vadd.f32 %v1209_v25, %v272_v27  ;;  %v338_v27 = vmax.f32 %v306_v24, 0.0  ;;  %v309_v31 = vadd.f32 %v1209_v25, %v308_v26 }
  0xe3   :  { %v327_v30 = vmax.f32 %v273_v28, 0.0  ;;  %v339_v33 = vmax.f32 %v309_v31, 0.0 }
  0xe5   :  { %408 = vmatmul.f32.gmra.mxu1 %v327_v30 }
  0xe8   :  { %v275_v34 = vpop.f32.mrf.mxu0 }
  0xe9   :  { %v276_v35 = vadd.f32 %v1209_v25, %v275_v34  ;;  %v311_v32 = vpop.f32.mrf.mxu3 }
  0xeb   :  { %v328_v37 = vmax.f32 %v276_v35, 0.0 }
  0xed   :  { %411 = vmatmul.f32.gmra.mxu1 %v328_v37  ;;  %v312_v37 = vadd.f32 %v1209_v25, %v311_v32 }
  0xef   :  { %v340_v38 = vmax.f32 %v312_v37, 0.0 }
  0xf0   :  { %v278_v41 = vpop.f32.mrf.mxu0 }
  0xf1   :  { %v279_v42 = vadd.f32 %v1209_v25, %v278_v41  ;;  %v314_v40 = vpop.f32.mrf.mxu3 }
  0xf2   :  { %v315_v43 = vadd.f32 %v1209_v25, %v314_v40 }
  0xf3   :  { %v329_v44 = vmax.f32 %v279_v42, 0.0 }
  0xf5   :  { %414 = vmatmul.f32.gmra.mxu1 %v329_v44  ;;  %v341_v44 = vmax.f32 %v315_v43, 0.0 }
  0xf8   :  { %v281_v47 = vpop.f32.mrf.mxu0 }
  0xf9   :  { %v282_v48 = vadd.f32 %v1209_v25, %v281_v47 }
  0xfb   :  { %v330_v49 = vmax.f32 %v282_v48, 0.0 }
  0xfd   :  { %417 = vmatmul.f32.gmra.mxu1 %v330_v49 }
 0x100   :  { %v284_v50 = vpop.f32.mrf.mxu0 }
 0x101   :  { %v285_v51 = vadd.f32 %v1209_v25, %v284_v50 }
 0x103   :  { %v331_v52 = vmax.f32 %v285_v51, 0.0 }
 0x105   :  { %420 = vmatmul.f32.gmra.mxu1 %v331_v52 }
 0x108   :  { %v287_v53 = vpop.f32.mrf.mxu0 }
 0x109   :  { %v288_v54 = vadd.f32 %v1209_v25, %v287_v53 }
 0x10b   :  { %v332_v55 = vmax.f32 %v288_v54, 0.0 }
 0x10d   :  { %423 = vmatmul.f32.gmra.mxu1 %v332_v55 }
 0x110   :  { %v290_v57 = vpop.f32.mrf.mxu0 }
 0x111   :  { %v291_v58 = vadd.f32 %v1209_v25, %v290_v57 }
 0x112   :  { %v379_v59 = vpop.f32.mrf.mxu1 }
 0x113   :  { %v333_v60 = vmax.f32 %v291_v58, 0.0  ;;  %v380_v61 = vadd.f32 %v1257_v56, %v379_v59 }
 0x115   :  { %v454_v62 = vmax.f32 %v380_v61, 0.0  ;;  %426 = vmatmul.f32.gmra.mxu1 %v333_v60 }
 0x117   :  { %515 = vmatmul.f32.vlgmr.msra.gmra.mxu2 %v454_v62 }
 0x118   :  { %v293_v63 = vpop.f32.mrf.mxu0 }
 0x119   :  { %v294_v0 = vadd.f32 %v1209_v25, %v293_v63 }
 0x11a   :  { %v382_v1 = vpop.f32.mrf.mxu1 }
 0x11b   :  { %v334_v2 = vmax.f32 %v294_v0, 0.0  ;;  %v383_v3 = vadd.f32 %v1257_v56, %v382_v1 }
 0x11d   :  { %v455_v4 = vmax.f32 %v383_v3, 0.0  ;;  %429 = vmatmul.f32.gmra.mxu1 %v334_v2 }
 0x11f   :  { %518 = vmatmul.f32.gmra.mxu2 %v455_v4 }
 0x120   :  { %v296_v5 = vpop.f32.mrf.mxu0 }
 0x121   :  { %v297_v6 = vadd.f32 %v1209_v25, %v296_v5 }
 0x122   :  { %v385_v7 = vpop.f32.mrf.mxu1 }
 0x123   :  { %v335_v8 = vmax.f32 %v297_v6, 0.0  ;;  %v386_v9 = vadd.f32 %v1257_v56, %v385_v7 }
 0x125   :  { %v456_v10 = vmax.f32 %v386_v9, 0.0  ;;  %432 = vmatmul.f32.vlgmr.msrb.gmra.mxu3 %v335_v8 }
 0x127   :  { %521 = vmatmul.f32.gmra.mxu2 %v456_v10 }
 0x128   :  { %v299_v11 = vpop.f32.mrf.mxu0 }
 0x129   :  { %v300_v12 = vadd.f32 %v1209_v25, %v299_v11 }
 0x12a   :  { %v388_v13 = vpop.f32.mrf.mxu1 }
 0x12b   :  { %v336_v14 = vmax.f32 %v300_v12, 0.0  ;;  %v389_v15 = vadd.f32 %v1257_v56, %v388_v13 }
 0x12d   :  { %v457_v17 = vmax.f32 %v389_v15, 0.0  ;;  %435 = vmatmul.f32.gmra.mxu3 %v336_v14 }
 0x12f   :  { %524 = vmatmul.f32.gmra.mxu2 %v457_v17 }
 0x130   :  { %v302_v18 = vpop.f32.mrf.mxu0 }
 0x131   :  { %v303_v19 = vadd.f32 %v1209_v25, %v302_v18 }
 0x132   :  { %v391_v20 = vpop.f32.mrf.mxu1 }
 0x133   :  { %v337_v21 = vmax.f32 %v303_v19, 0.0  ;;  %v392_v22 = vadd.f32 %v1257_v56, %v391_v20 }
 0x135   :  { %v458_v23 = vmax.f32 %v392_v22, 0.0  ;;  %438 = vmatmul.f32.gmra.mxu3 %v337_v21  ;;  %v1291_v21 = vld [vmem:[%s1537_s6] ss:$0 sm:$0xff]  ;;  %s1032_s6 = smov [#allocation5]  }
 0x136   :  { %s794_s25 = sshll.u32 %s1032_s6, 4  ;;  %s795_s25 = int_to_ptr.vmem [resolvable:$true] %s794_s25 }
 0x137   :  { %527 = vmatmul.f32.gmra.mxu2 %v458_v23 }
 0x13a   :  { %v394_v28 = vpop.f32.mrf.mxu1 }
 0x13b   :  { %v395_v29 = vadd.f32 %v1257_v56, %v394_v28 }
 0x13d   :  { %v459_v30 = vmax.f32 %v395_v29, 0.0  ;;  %441 = vmatmul.f32.gmra.mxu3 %v338_v27 }
 0x13f   :  { %530 = vmatmul.f32.gmra.mxu2 %v459_v30 }
 0x142   :  { %v397_v34 = vpop.f32.mrf.mxu1 }
 0x143   :  { %v398_v35 = vadd.f32 %v1257_v56, %v397_v34 }
 0x145   :  { %v460_v36 = vmax.f32 %v398_v35, 0.0  ;;  %444 = vmatmul.f32.gmra.mxu3 %v339_v33 }
 0x147   :  { %533 = vmatmul.f32.gmra.mxu2 %v460_v36 }
 0x14a   :  { %v400_v39 = vpop.f32.mrf.mxu1 }
 0x14b   :  { %v401_v41 = vadd.f32 %v1257_v56, %v400_v39 }
 0x14d   :  { %v461_v42 = vmax.f32 %v401_v41, 0.0  ;;  %447 = vmatmul.f32.gmra.mxu3 %v340_v38 }
 0x14f   :  { %536 = vmatmul.f32.gmra.mxu2 %v461_v42 }
 0x152   :  { %v403_v45 = vpop.f32.mrf.mxu1 }
 0x153   :  { %v404_v46 = vadd.f32 %v1257_v56, %v403_v45 }
 0x155   :  { %v462_v47 = vmax.f32 %v404_v46, 0.0  ;;  %450 = vmatmul.f32.gmra.mxu3 %v341_v44 }
 0x157   :  { %539 = vmatmul.f32.gmra.mxu2 %v462_v47 }
 0x15a   :  { %v406_v48 = vpop.f32.mrf.mxu1 }
 0x15b   :  { %v407_v49 = vadd.f32 %v1257_v56, %v406_v48 }
 0x15d   :  { %v463_v50 = vmax.f32 %v407_v49, 0.0 }
 0x15f   :  { %542 = vmatmul.f32.gmra.mxu2 %v463_v50 }
 0x162   :  { %v409_v51 = vpop.f32.mrf.mxu1 }
 0x163   :  { %v410_v52 = vadd.f32 %v1257_v56, %v409_v51 }
 0x165   :  { %v464_v53 = vmax.f32 %v410_v52, 0.0 }
 0x167   :  { %545 = vmatmul.f32.gmra.mxu2 %v464_v53 }
 0x16a   :  { %v412_v54 = vpop.f32.mrf.mxu1 }
 0x16b   :  { %v413_v25 = vadd.f32 %v1257_v56, %v412_v54 }
 0x16d   :  { %v465_v55 = vmax.f32 %v413_v25, 0.0 }
 0x16f   :  { %548 = vmatmul.f32.gmra.mxu2 %v465_v55 }
 0x172   :  { %v415_v57 = vpop.f32.mrf.mxu1 }
 0x173   :  { %v416_v58 = vadd.f32 %v1257_v56, %v415_v57 }
 0x175   :  { %v466_v59 = vmax.f32 %v416_v58, 0.0 }
 0x177   :  { %551 = vmatmul.f32.gmra.mxu2 %v466_v59 }
 0x17a   :  { %v418_v60 = vpop.f32.mrf.mxu1 }
 0x17b   :  { %v419_v61 = vadd.f32 %v1257_v56, %v418_v60 }
 0x17d   :  { %v467_v62 = vmax.f32 %v419_v61, 0.0 }
 0x17f   :  { %554 = vmatmul.f32.gmra.mxu2 %v467_v62 }
 0x182   :  { %v421_v63 = vpop.f32.mrf.mxu1 }
 0x183   :  { %v422_v0 = vadd.f32 %v1257_v56, %v421_v63 }
 0x185   :  { %v468_v1 = vmax.f32 %v422_v0, 0.0 }
 0x187   :  { %557 = vmatmul.f32.gmra.mxu2 %v468_v1 }
 0x18a   :  { %v424_v2 = vpop.f32.mrf.mxu1 }
 0x18b   :  { %v425_v3 = vadd.f32 %v1257_v56, %v424_v2 }
 0x18d   :  { %v469_v4 = vmax.f32 %v425_v3, 0.0 }
 0x18f   :  { %560 = vmatmul.f32.gmra.mxu2 %v469_v4 }
 0x192   :  { %v427_v5 = vpop.f32.mrf.mxu1 }
 0x193   :  { %v428_v6 = vadd.f32 %v1257_v56, %v427_v5 }
 0x195   :  { %v470_v7 = vmax.f32 %v428_v6, 0.0 }
 0x197   :  { %563 = vmatmul.f32.gmra.mxu2 %v470_v7 }
 0x19a   :  { %v430_v8 = vpop.f32.mrf.mxu1  ;;  %v516_v9 = vpop.f32.mrf.mxu2 }
 0x19b   :  { %v431_v10 = vadd.f32 %v1257_v56, %v430_v8  ;;  %v1295_v26 = vadd.f32 %v1291_v21, %v516_v9 }
 0x19d   :  { %v471_v11 = vmax.f32 %v431_v10, 0.0 }
 0x19f   :  { %566 = vmatmul.f32.gmra.mxu2 %v471_v11 }
 0x1a2   :  { %v519_v12 = vpop.f32.mrf.mxu2 }
 0x1a3   :  { %v1304_v33 = vadd.f32 %v1291_v21, %v519_v12 }
 0x1a8   :  { %v433_v13 = vpop.f32.mrf.mxu3 }
 0x1a9   :  { %v434_v14 = vadd.f32 %v1257_v56, %v433_v13 }
 0x1aa   :  { %v522_v15 = vpop.f32.mrf.mxu2 }
 0x1ab   :  { %v472_v16 = vmax.f32 %v434_v14, 0.0  ;;  %v1313_v40 = vadd.f32 %v1291_v21, %v522_v15 }
 0x1ad   :  { %569 = vmatmul.f32.vlgmr.msra.gmra.mxu3 %v472_v16 }
 0x1b0   :  { %v436_v17 = vpop.f32.mrf.mxu3 }
 0x1b1   :  { %v437_v18 = vadd.f32 %v1257_v56, %v436_v17 }
 0x1b2   :  { %v525_v19 = vpop.f32.mrf.mxu2 }
 0x1b3   :  { %v473_v20 = vmax.f32 %v437_v18, 0.0  ;;  %v1322_v47 = vadd.f32 %v1291_v21, %v525_v19 }
 0x1b5   :  { %572 = vmatmul.f32.gmra.mxu3 %v473_v20 }
 0x1b8   :  { %v439_v22 = vpop.f32.mrf.mxu3 }
 0x1b9   :  { %v440_v23 = vadd.f32 %v1257_v56, %v439_v22 }
 0x1ba   :  { %v528_v24 = vpop.f32.mrf.mxu2 }
 0x1bb   :  { %v474_v27 = vmax.f32 %v440_v23, 0.0  ;;  %v1298_v28 = vadd.f32 %v1291_v21, %v528_v24 }
 0x1bd   :  { %v591_v29 = vmax.f32 %v1295_v26, %v1298_v28  ;;  %575 = vmatmul.f32.gmra.mxu3 %v474_v27 }
 0x1c0   :  { %v442_v30 = vpop.f32.mrf.mxu3 }
 0x1c1   :  { %v443_v31 = vadd.f32 %v1257_v56, %v442_v30 }
 0x1c2   :  { %v531_v32 = vpop.f32.mrf.mxu2 }
 0x1c3   :  { %v475_v34 = vmax.f32 %v443_v31, 0.0  ;;  %v1307_v35 = vadd.f32 %v1291_v21, %v531_v32 }
 0x1c5   :  { %v592_v36 = vmax.f32 %v1304_v33, %v1307_v35  ;;  %578 = vmatmul.f32.gmra.mxu3 %v475_v34 }
 0x1c8   :  { %v445_v37 = vpop.f32.mrf.mxu3 }
 0x1c9   :  { %v446_v38 = vadd.f32 %v1257_v56, %v445_v37 }
 0x1ca   :  { %v534_v39 = vpop.f32.mrf.mxu2 }
 0x1cb   :  { %v476_v41 = vmax.f32 %v446_v38, 0.0  ;;  %v1316_v42 = vadd.f32 %v1291_v21, %v534_v39 }
 0x1cd   :  { %v593_v43 = vmax.f32 %v1313_v40, %v1316_v42  ;;  %581 = vmatmul.f32.gmra.mxu3 %v476_v41 }
 0x1d0   :  { %v448_v44 = vpop.f32.mrf.mxu3 }
 0x1d1   :  { %v449_v45 = vadd.f32 %v1257_v56, %v448_v44 }
 0x1d2   :  { %v537_v46 = vpop.f32.mrf.mxu2 }
 0x1d3   :  { %v477_v48 = vmax.f32 %v449_v45, 0.0  ;;  %v1325_v49 = vadd.f32 %v1291_v21, %v537_v46 }
 0x1d5   :  { %v594_v50 = vmax.f32 %v1322_v47, %v1325_v49  ;;  %584 = vmatmul.f32.gmra.mxu3 %v477_v48 }
 0x1d8   :  { %v451_v51 = vpop.f32.mrf.mxu3 }
 0x1d9   :  { %v452_v52 = vadd.f32 %v1257_v56, %v451_v51 }
 0x1da   :  { %v540_v53 = vpop.f32.mrf.mxu2 }
 0x1db   :  { %v478_v54 = vmax.f32 %v452_v52, 0.0  ;;  %v1331_v25 = vadd.f32 %v1291_v21, %v540_v53 }
 0x1dd   :  { %v595_v55 = vmax.f32 %v591_v29, %v1331_v25  ;;  %587 = vmatmul.f32.gmra.mxu3 %v478_v54 }
 0x1e2   :  { %v543_v57 = vpop.f32.mrf.mxu2 }
 0x1e3   :  { %v1360_v16 = vadd.f32 %v1291_v21, %v543_v57 }
 0x1e5   :  { %v596_v31 = vmax.f32 %v592_v36, %v1360_v16 }
 0x1ea   :  { %v546_v58 = vpop.f32.mrf.mxu2 }
 0x1eb   :  { %v1335_v5 = vadd.f32 %v1291_v21, %v546_v58 }
 0x1ed   :  { %v597_v9 = vmax.f32 %v593_v43, %v1335_v5 }
 0x1f2   :  { %v549_v59 = vpop.f32.mrf.mxu2 }
 0x1f3   :  { %v1338_v6 = vadd.f32 %v1291_v21, %v549_v59 }
 0x1f5   :  { %v598_v10 = vmax.f32 %v594_v50, %v1338_v6 }
 0x1fa   :  { %v552_v60 = vpop.f32.mrf.mxu2 }
 0x1fb   :  { %v1363_v18 = vadd.f32 %v1291_v21, %v552_v60 }
 0x1fd   :  { %v599_v32 = vmax.f32 %v595_v55, %v1363_v18 }
 0x202   :  { %v555_v62 = vpop.f32.mrf.mxu2 }
 0x203   :  { %v1371_v24 = vadd.f32 %v1291_v21, %v555_v62 }
 0x205   :  { %v600_v39 = vmax.f32 %v596_v31, %v1371_v24 }
 0x20a   :  { %v558_v0 = vpop.f32.mrf.mxu2 }
 0x20b   :  { %v1341_v7 = vadd.f32 %v1291_v21, %v558_v0 }
 0x20d   :  { %v601_v13 = vmax.f32 %v597_v9, %v1341_v7 }
 0x212   :  { %v561_v2 = vpop.f32.mrf.mxu2 }
 0x213   :  { %v1344_v8 = vadd.f32 %v1291_v21, %v561_v2 }
 0x215   :  { %v602_v14 = vmax.f32 %v598_v10, %v1344_v8 }
 0x21a   :  { %v564_v56 = vpop.f32.mrf.mxu2 }
 0x21b   :  { %v1374_v27 = vadd.f32 %v1291_v21, %v564_v56 }
 0x21d   :  { %v603_v41 = vmax.f32 %v599_v32, %v1374_v27 }
 0x222   :  { %v567_v23 = vpop.f32.mrf.mxu2 }
 0x223   :  { %v1381_v34 = vadd.f32 %v1291_v21, %v567_v23 }
 0x225   :  { %v604_v45 = vmax.f32 %v600_v39, %v1381_v34 }
 0x230   :  { %v570_v61 = vpop.f32.mrf.mxu3 }
 0x231   :  { %v1349_v11 = vadd.f32 %v1291_v21, %v570_v61 }
 0x233   :  { %v605_v19 = vmax.f32 %v601_v13, %v1349_v11 }
 0x238   :  { %v573_v63 = vpop.f32.mrf.mxu3 }
 0x239   :  { %v1352_v12 = vadd.f32 %v1291_v21, %v573_v63 }
 0x23b   :  { %v606_v20 = vmax.f32 %v602_v14, %v1352_v12 }
 0x240   :  { %v576_v1 = vpop.f32.mrf.mxu3 }
 0x241   :  { %v1384_v37 = vadd.f32 %v1291_v21, %v576_v1 }
 0x243   :  { %v607_v36 = vmax.f32 %v603_v41, %v1384_v37 }
 0x248   :  { %v579_v3 = vpop.f32.mrf.mxu3 }
 0x249   :  { %v1389_v43 = vadd.f32 %v1291_v21, %v579_v3 }
 0x24b   :  { %v608_v48 = vmax.f32 %v604_v45, %v1389_v43 }
 0x250   :  { %v582_v4 = vpop.f32.mrf.mxu3 }
 0x251   :  { %v1357_v15 = vadd.f32 %v1291_v21, %v582_v4 }
 0x253   :  { %v609_v29 = vmax.f32 %v605_v19, %v1357_v15 }
 0x258   :  { %v585_v17 = vpop.f32.mrf.mxu3 }
 0x259   :  { %v1368_v22 = vadd.f32 %v1291_v21, %v585_v17 }
 0x25b   :  { %v610_v30 = vmax.f32 %v606_v20, %v1368_v22 }
 0x25d   :  { %v613_v38 = vmax.f32 %v609_v29, %v610_v30 }
 0x260   :  { %v588_v44 = vpop.f32.mrf.mxu3 }
 0x261   :  { %v1394_v46 = vadd.f32 %v1291_v21, %v588_v44 }
 0x263   :  { %v611_v50 = vmax.f32 %v607_v36, %v1394_v46 }
 0x265   :  { %v612_v51 = vmax.f32 %v611_v50, %v608_v48 }
 0x267   :  { %v614_v52 = vmax.f32 %v612_v51, %v613_v38 }
 0x269   :  { %v615_v53 = vrot.slane %v614_v52, 4 }
 0x26b   :  { %v616_v54 = vmax.f32 %v614_v52, %v615_v53 }
 0x26d   :  { %v617_v55 = vrot.slane %v616_v54, 2 }
 0x26f   :  { %v618_v57 = vmax.f32 %v616_v54, %v617_v55 }
 0x271   :  { %v619_v58 = vrot.slane %v618_v57, 1 }
 0x273   :  { %v1398_v59 = vmax.f32 %v618_v57, %v619_v58 }
 0x275   :  { %v621_v60 = vsub.f32 %v1295_v26, %v1398_v59  ;;  %v622_v21 = vsub.f32 %v1304_v33, %v1398_v59  ;;  %v623_v61 = vsub.f32 %v1313_v40, %v1398_v59  ;;  %v624_v62 = vsub.f32 %v1322_v47, %v1398_v59 }
 0x276   :  { %v625_v63 = vsub.f32 %v1298_v28, %v1398_v59  ;;  %v626_v0 = vsub.f32 %v1307_v35, %v1398_v59  ;;  %v627_v1 = vsub.f32 %v1316_v42, %v1398_v59  ;;  %v628_v26 = vsub.f32 %v1325_v49, %v1398_v59 }
 0x277   :  { %v629_v33 = vsub.f32 %v1331_v25, %v1398_v59  ;;  %v645_v40 = vsub.f32 %v1394_v46, %v1398_v59  ;;  %v646_v2 = vmul.f32 1.442695, %v621_v60  ;;  %v648_v47 = vmul.f32 1.442695, %v622_v21 }
 0x278   :  { %v650_v3 = vmul.f32 1.442695, %v623_v61  ;;  %v652_v28 = vmul.f32 1.442695, %v624_v62  ;;  %v654_v35 = vmul.f32 1.442695, %v625_v63  ;;  %v630_v10 = vsub.f32 %v1360_v16, %v1398_v59 }
 0x279   :  { %925 = vpow2.f32 %v646_v2  ;;  %v656_v56 = vmul.f32 1.442695, %v626_v0  ;;  %v658_v49 = vmul.f32 1.442695, %v627_v1  ;;  %v660_v13 = vmul.f32 1.442695, %v628_v26 }
 0x27a   :  { %927 = vpow2.f32 %v648_v47  ;;  %v631_v19 = vsub.f32 %v1335_v5, %v1398_v59  ;;  %v662_v20 = vmul.f32 1.442695, %v629_v33  ;;  %v632_v30 = vsub.f32 %v1338_v6, %v1398_v59 }
 0x27b   :  { %929 = vpow2.f32 %v650_v3  ;;  %v664_v16 = vmul.f32 1.442695, %v630_v10  ;;  %v633_v38 = vsub.f32 %v1363_v18, %v1398_v59  ;;  %v634_v44 = vsub.f32 %v1371_v24, %v1398_v59 }
 0x27c   :  { %931 = vpow2.f32 %v652_v28  ;;  %v666_v5 = vmul.f32 1.442695, %v631_v19  ;;  %v668_v6 = vmul.f32 1.442695, %v632_v30  ;;  %v635_v48 = vsub.f32 %v1341_v7, %v1398_v59 }
 0x27d   :  { %933 = vpow2.f32 %v654_v35  ;;  %v670_v18 = vmul.f32 1.442695, %v633_v38  ;;  %v636_v52 = vsub.f32 %v1344_v8, %v1398_v59  ;;  %v672_v24 = vmul.f32 1.442695, %v634_v44 }
 0x27e   :  { %935 = vpow2.f32 %v656_v56  ;;  %v637_v55 = vsub.f32 %v1374_v27, %v1398_v59  ;;  %v674_v7 = vmul.f32 1.442695, %v635_v48  ;;  %v638_v60 = vsub.f32 %v1381_v34, %v1398_v59 }
 0x27f   :  { %v1420_v42 = vpop.eup %925  ;;  %937 = vpow2.f32 %v658_v49  ;;  %v676_v8 = vmul.f32 1.442695, %v636_v52  ;;  %v639_v62 = vsub.f32 %v1349_v11, %v1398_v59  ;;  %v640_v1 = vsub.f32 %v1352_v12, %v1398_v59 }
 0x280   :  { %v1422_v4 = vpop.eup %927  ;;  %939 = vpow2.f32 %v660_v13  ;;  %v678_v27 = vmul.f32 1.442695, %v637_v55  ;;  %v680_v34 = vmul.f32 1.442695, %v638_v60  ;;  %v641_v2 = vsub.f32 %v1384_v37, %v1398_v59 }
 0x281   :  { %v696_v25 = vadd.f32 %v1422_v4, %v1420_v42  ;;  %v1426_v9 = vpop.eup %929  ;;  %941 = vpow2.f32 %v662_v20  ;;  %v682_v11 = vmul.f32 1.442695, %v639_v62  ;;  %v642_v28 = vsub.f32 %v1389_v43, %v1398_v59 }
 0x282   :  { %v1431_v17 = vpop.eup %931  ;;  %943 = vpow2.f32 %v664_v16  ;;  %v684_v12 = vmul.f32 1.442695, %v640_v1  ;;  %v643_v49 = vsub.f32 %v1357_v15, %v1398_v59  ;;  %v686_v37 = vmul.f32 1.442695, %v641_v2 }
 0x283   :  { %v697_v14 = vadd.f32 %v1426_v9, %v696_v25  ;;  %v1436_v29 = vpop.eup %933  ;;  %945 = vpow2.f32 %v666_v5  ;;  %v644_v13 = vsub.f32 %v1368_v22, %v1398_v59  ;;  %v688_v43 = vmul.f32 1.442695, %v642_v28 }
 0x284   :  { %v1441_v32 = vpop.eup %935  ;;  %947 = vpow2.f32 %v668_v6  ;;  %v690_v20 = vmul.f32 1.442695, %v643_v49  ;;  %v694_v22 = vmul.f32 1.442695, %v645_v40 }
 0x285   :  { %v698_v23 = vadd.f32 %v1431_v17, %v697_v14  ;;  %v1446_v41 = vpop.eup %937  ;;  %949 = vpow2.f32 %v670_v18  ;;  %v692_v30 = vmul.f32 1.442695, %v644_v13 }
 0x286   :  { %v1451_v36 = vpop.eup %939  ;;  %951 = vpow2.f32 %v672_v24 }
 0x287   :  { %v699_v31 = vadd.f32 %v1436_v29, %v698_v23  ;;  %v1456_v51 = vpop.eup %941  ;;  %953 = vpow2.f32 %v674_v7 }
 0x288   :  { %v1461_v54 = vpop.eup %943  ;;  %955 = vpow2.f32 %v676_v8 }
 0x289   :  { %v700_v39 = vadd.f32 %v1441_v32, %v699_v31  ;;  %v1466_v58 = vpop.eup %945  ;;  %957 = vpow2.f32 %v678_v27 }
 0x28a   :  { %v1471_v61 = vpop.eup %947  ;;  %959 = vpow2.f32 %v680_v34 }
 0x28b   :  { %v701_v45 = vadd.f32 %v1446_v41, %v700_v39  ;;  %v1476_v0 = vpop.eup %949  ;;  %961 = vpow2.f32 %v682_v11 }
 0x28c   :  { %v1481_v33 = vpop.eup %951  ;;  %963 = vpow2.f32 %v684_v12 }
 0x28d   :  { %v702_v50 = vadd.f32 %v1451_v36, %v701_v45  ;;  %v1486_v3 = vpop.eup %953  ;;  %965 = vpow2.f32 %v686_v37 }
 0x28e   :  { %v1491_v56 = vpop.eup %955  ;;  %967 = vpow2.f32 %v688_v43 }
 0x28f   :  { %v703_v53 = vadd.f32 %v1456_v51, %v702_v50  ;;  %v1496_v10 = vpop.eup %957  ;;  %969 = vpow2.f32 %v690_v20 }
 0x290   :  { %v1501_v19 = vpop.eup %959  ;;  %971 = vpow2.f32 %v692_v30 }
 0x291   :  { %v704_v57 = vadd.f32 %v1461_v54, %v703_v53  ;;  %v962_v15 = vpop.eup %961  ;;  %973 = vpow2.f32 %v694_v22 }
 0x292   :  { %v964_v31 = vpop.eup %963 }
 0x293   :  { %v705_v21 = vadd.f32 %v1466_v58, %v704_v57  ;;  %v966_v5 = vpop.eup %965 }
 0x294   :  { %v968_v44 = vpop.eup %967 }
 0x295   :  { %v706_v63 = vadd.f32 %v1471_v61, %v705_v21  ;;  %v970_v45 = vpop.eup %969 }
 0x296   :  { %v972_v18 = vpop.eup %971 }
 0x297   :  { %v707_v26 = vadd.f32 %v1476_v0, %v706_v63  ;;  %v974_v52 = vpop.eup %973 }
 0x299   :  { %v708_v47 = vadd.f32 %v1481_v33, %v707_v26 }
 0x29b   :  { %v709_v35 = vadd.f32 %v1486_v3, %v708_v47 }
 0x29d   :  { %v710_v25 = vadd.f32 %v1491_v56, %v709_v35 }
 0x29f   :  { %v711_v14 = vadd.f32 %v1496_v10, %v710_v25 }
 0x2a1   :  { %v712_v23 = vadd.f32 %v1501_v19, %v711_v14 }
 0x2a3   :  { %v713_v16 = vadd.f32 %v962_v15, %v712_v23 }
 0x2a5   :  { %v714_v38 = vadd.f32 %v964_v31, %v713_v16 }
 0x2a7   :  { %v715_v39 = vadd.f32 %v966_v5, %v714_v38 }
 0x2a9   :  { %v716_v6 = vadd.f32 %v968_v44, %v715_v39 }
 0x2ab   :  { %v717_v48 = vadd.f32 %v970_v45, %v716_v6 }
 0x2ad   :  { %v718_v50 = vadd.f32 %v972_v18, %v717_v48 }
 0x2af   :  { %v719_v24 = vadd.f32 %v974_v52, %v718_v50 }
 0x2b1   :  { %v720_v53 = vrot.slane %v719_v24, 4 }
 0x2b3   :  { %v721_v55 = vadd.f32 %v720_v53, %v719_v24 }
 0x2b5   :  { %v722_v7 = vrot.slane %v721_v55, 2 }
 0x2b7   :  { %v723_v57 = vadd.f32 %v722_v7, %v721_v55 }
 0x2b9   :  { %v724_v60 = vrot.slane %v723_v57, 1 }
 0x2bb   :  { %v725_v46 = vadd.f32 %v724_v60, %v723_v57 }
 0x2bd   :  { %975 = vrcp.f32 %v725_v46  ;;  %v737_v21 = vand.u32 2147483648, %v725_v46  ;;  %v735_v27 = vand.u32 2147483647, %v725_v46  ;;  %vm731_vm2 = vweird.f32 %v725_v46 }
 0x2bf   :  { %v738_v1 = vor.u32 1.1754944e-38, %v737_v21  ;;  %vm736_vm4 = vcmp.eq.f32.partialorder %v735_v27, 8.507059e+37 }
 0x2c3   :  { %v976_v59 = vpop.eup %975 }
 0x2c4   :  { %v727_v40 = vmul.f32 %v976_v59, %v725_v46  ;;  %vm732_vm1 = vweird.f32 %v976_v59 }
 0x2c5   :  { %vm733_vm3 = vmor %vm731_vm2, %vm732_vm1 }
 0x2c6   :  { %v728_v8 = vsub.f32 1.0, %v727_v40 }
 0x2c8   :  { %v729_v62 = vmul.f32 %v976_v59, %v728_v8 }
 0x2ca   :  { %v730_v63 = vadd.f32 %v976_v59, %v729_v62 }
 0x2cc   :  { %v734_v34 = vsel %vm733_vm3, %v976_v59, %v730_v63 }
 0x2cd   :  { %v739_v26 = vsel %vm736_vm4, %v738_v1, %v734_v34 }
 0x2ce   :  { %v740_v2 = vmul.f32 %v1420_v42, %v739_v26  ;;  %v741_v11 = vmul.f32 %v1422_v4, %v739_v26  ;;  %v742_v47 = vmul.f32 %v1426_v9, %v739_v26  ;;  %v743_v28 = vmul.f32 %v1431_v17, %v739_v26 }
 0x2cf   :  { %v744_v12 = vmul.f32 %v1436_v29, %v739_v26  ;;  %v745_v35 = vmul.f32 %v1441_v32, %v739_v26  ;;  %v746_v49 = vmul.f32 %v1446_v41, %v739_v26  ;;  %v747_v37 = vmul.f32 %v1451_v36, %v739_v26 }
 0x2d0   :  { %v749_v25 = vmul.f32 %v1461_v54, %v739_v26  ;;  %v750_v13 = vmul.f32 %v1466_v58, %v739_v26  ;;  %v751_v42 = vmul.f32 %v1471_v61, %v739_v26  ;;  %765 = vst [vmem:[#allocation5] sm:$0xff] %v740_v2  ;;  %v752_v4 = vmul.f32 %v1476_v0, %v739_v26 }
 0x2d1   :  { %v753_v9 = vmul.f32 %v1481_v33, %v739_v26  ;;  %v754_v17 = vmul.f32 %v1486_v3, %v739_v26  ;;  %v755_v29 = vmul.f32 %v1491_v56, %v739_v26  ;;  %766 = vst [vmem:[#allocation5 + $0x8] sm:$0xff] %v741_v11  ;;  %v756_v32 = vmul.f32 %v1496_v10, %v739_v26 }
 0x2d2   :  { %v757_v41 = vmul.f32 %v1501_v19, %v739_v26  ;;  %v758_v36 = vmul.f32 %v962_v15, %v739_v26  ;;  %v759_v54 = vmul.f32 %v964_v31, %v739_v26  ;;  %767 = vst [vmem:[#allocation5 + $0x10] sm:$0xff] %v742_v47  ;;  %v760_v58 = vmul.f32 %v966_v5, %v739_v26 }
 0x2d3   :  { %v761_v43 = vmul.f32 %v968_v44, %v739_v26  ;;  %v762_v61 = vmul.f32 %v970_v45, %v739_v26  ;;  %v763_v14 = vmul.f32 %v972_v18, %v739_v26  ;;  %768 = vst [vmem:[#allocation5 + $0x18] sm:$0xff] %v743_v28  ;;  %v748_v0 = vmul.f32 %v1456_v51, %v739_v26 }
 0x2d4   :  { %v764_v33 = vmul.f32 %v974_v52, %v739_v26  ;;  %769 = vst [vmem:[#allocation5 + $0x20] sm:$0xff] %v744_v12 }
 0x2d5   :  { %770 = vst [vmem:[#allocation5 + $0x28] sm:$0xff] %v745_v35 }
 0x2d6   :  { %771 = vst [vmem:[#allocation5 + $0x30] sm:$0xff] %v746_v49 }
 0x2d7   :  { %772 = vst [vmem:[#allocation5 + $0x38] sm:$0xff] %v747_v37 }
 0x2d8   :  { %773 = vst [vmem:[#allocation5 + $0x40] sm:$0xff] %v748_v0 }
 0x2d9   :  { %774 = vst [vmem:[#allocation5 + $0x48] sm:$0xff] %v749_v25 }
 0x2da   :  { %775 = vst [vmem:[#allocation5 + $0x50] sm:$0xff] %v750_v13 }
 0x2db   :  { %776 = vst [vmem:[#allocation5 + $0x58] sm:$0xff] %v751_v42 }
 0x2dc   :  { %777 = vst [vmem:[#allocation5 + $0x60] sm:$0xff] %v752_v4 }
 0x2dd   :  { %778 = vst [vmem:[#allocation5 + $0x68] sm:$0xff] %v753_v9 }
 0x2de   :  { %779 = vst [vmem:[#allocation5 + $0x70] sm:$0xff] %v754_v17 }
 0x2df   :  { %780 = vst [vmem:[#allocation5 + $0x78] sm:$0xff] %v755_v29 }
 0x2e0   :  { %781 = vst [vmem:[#allocation5 + $0x80] sm:$0xff] %v756_v32 }
 0x2e1   :  { %782 = vst [vmem:[#allocation5 + $0x88] sm:$0xff] %v757_v41 }
 0x2e2   :  { %783 = vst [vmem:[#allocation5 + $0x90] sm:$0xff] %v758_v36 }
 0x2e3   :  { %784 = vst [vmem:[#allocation5 + $0x98] sm:$0xff] %v759_v54 }
 0x2e4   :  { %785 = vst [vmem:[#allocation5 + $0xa0] sm:$0xff] %v760_v58 }
 0x2e5   :  { %786 = vst [vmem:[#allocation5 + $0xa8] sm:$0xff] %v761_v43 }
 0x2e6   :  { %787 = vst [vmem:[#allocation5 + $0xb0] sm:$0xff] %v762_v61 }
 0x2e7   :  { %788 = vst [vmem:[#allocation5 + $0xb8] sm:$0xff] %v763_v14 }
 0x2e8   :  { %789 = vst [vmem:[#allocation5 + $0xc0] sm:$0xff] %v764_v33 }
 0x2e9   :  { %802 = dma.vmem_to_hbm [thread:$0]  %s795_s25, 3200, %s797_s28, [#allocation4], %s1030_s29, %s1030_s29, %s1031_s30  }
 0x2ea   :  { %1027 = dma.done.wait [#allocation4], 3200  }
 0x2eb   :  { %1028 = vsyncadd [#allocation4], 4294964096 }
 0x2ec   :  { %807 = vsyncpa [#allocation3], 1 }
 0x2ed   :  { %808 = vsyncpa [#allocation4], 1 }

</bundles_post_ra>
